<compile_context>
chip_gen: v7x
topology: tpu7x:2x2x1
jax: 0.10.0
libtpu: 0.0.40
codegen_flags: <defaults>
</compile_context>

<pallas_src>
import functools

import numpy as np

import jax
import jax.numpy as jnp
from jax.experimental import pallas as pl
from jax.experimental.pallas import tpu as pltpu


@functools.lru_cache(maxsize=None)
def bilinear_matrix(out_size: int, in_size: int) -> np.ndarray:
    """(out, in) row-stochastic matrix matching F.interpolate(mode='bilinear',
    align_corners=False). Built with numpy once per shape pair (cached)."""
    m = np.zeros((out_size, in_size), np.float32)
    scale = in_size / out_size
    for i in range(out_size):
        src = (i + 0.5) * scale - 0.5
        src = min(max(src, 0.0), float(in_size - 1))
        i0 = int(np.floor(src))
        i1 = min(i0 + 1, in_size - 1)
        w1 = src - i0
        m[i, i0] += 1.0 - w1
        m[i, i1] += w1
    # Rows summing to 1 is the invariant that keeps the "apply the 1x1 high
    # classifier BEFORE the resize + fuse b_high into the post-upsample bias"
    # rewrite exact; assert it so a future interpolation change can't silently
    # break the kernel.
    assert np.allclose(m.sum(axis=1), 1.0, atol=1e-6), "interp rows must sum to 1"
    return m


@functools.lru_cache(maxsize=None)
def upsample_operands(Hl: int, Wl: int, Hh: int, Wh: int):
    """bf16 right-multiply operands for separable bilinear upsampling of a
    channel-major (K, Hh*Wh) map to (K, Hl*Wl):
        width : z  @ kron(I_Hh, mw^T)   shape (Hh*Wh, Hh*Wl)
        height: zw @ kron(mh^T, I_Wl)   shape (Hh*Wl, Hl*Wl)
    2x-ratio interpolation weights (0.25/0.75) are exactly representable in bf16."""
    mh = bilinear_matrix(Hl, Hh)
    mw = bilinear_matrix(Wl, Wh)
    mw_blk = np.kron(np.eye(Hh, dtype=np.float32), mw.T)   # (Sh, Hh*Wl)
    mh_exp = np.kron(mh.T, np.eye(Wl, dtype=np.float32))   # (Hh*Wl, Sl)
    return (jnp.asarray(mw_blk, jnp.bfloat16),
            jnp.asarray(mh_exp, jnp.bfloat16))


def make_params(key, low_channels, high_channels, num_classes, inter_channels):
    ks = jax.random.split(key, 10)
    sc = 0.1
    # PyTorch-layout (out, in) 1x1-conv weights; kept channel-major.
    w_cbr = sc * jax.random.normal(ks[0], (inter_channels, high_channels), jnp.float32)
    w_scale = sc * jax.random.normal(ks[1], (inter_channels, high_channels), jnp.float32)
    w_low = sc * jax.random.normal(ks[2], (num_classes, low_channels), jnp.float32)
    b_low = sc * jax.random.normal(ks[3], (num_classes,), jnp.float32)
    w_high = sc * jax.random.normal(ks[4], (num_classes, inter_channels), jnp.float32)
    b_high = sc * jax.random.normal(ks[5], (num_classes,), jnp.float32)
    # BatchNorm2d(inter_channels) eval-mode parameters.
    gamma = 1.0 + sc * jax.random.normal(ks[6], (inter_channels,), jnp.float32)
    beta = sc * jax.random.normal(ks[7], (inter_channels,), jnp.float32)
    run_mean = sc * jax.random.normal(ks[8], (inter_channels,), jnp.float32)
    run_var = jnp.abs(1.0 + sc * jax.random.normal(ks[9], (inter_channels,), jnp.float32))
    eps = 1e-5

    # Fold BN into the cbr conv: y = gamma * (W x - mean) / sqrt(var+eps) + beta.
    inv_std = gamma / jnp.sqrt(run_var + eps)                  # (Ci,)
    w_cbr_fold = w_cbr * inv_std[:, None]                      # (Ci, Ch)
    b_cbr_fold = (beta - run_mean * inv_std)[:, None]          # (Ci, 1)

    return dict(
        w_cbr=w_cbr_fold.astype(jnp.bfloat16),     # (Ci, Ch) bf16, BN folded
        b_cbr=b_cbr_fold,                          # (Ci, 1)  f32
        w_scale=w_scale.astype(jnp.bfloat16),      # (Ci, Ch) bf16
        w_low=w_low.astype(jnp.bfloat16),          # (K, Cl)  bf16
        w_high=w_high.astype(jnp.bfloat16),        # (K, Ci)  bf16
        b_cls=(b_low + b_high)[:, None],           # (K, 1)   f32, fused bias
    )


def lraspp_head(low_nchw, high_nchw, params, *, batch_block=None,
                out_dtype=jnp.float32):
    """low:(N,Cl,Hl,Wl), high:(N,Ch,Hh,Wh) -> (N,K,Hl,Wl)."""
    N, Cl, Hl, Wl = low_nchw.shape
    _, Ch, Hh, Wh = high_nchw.shape
    Ci = params["w_cbr"].shape[0]
    K = params["w_low"].shape[0]
    Sl, Sh = Hl * Wl, Hh * Wh
    Sm = Hh * Wl  # width-interpolated, height not yet

    if batch_block is None:
        # Keep >=2 parallel grid steps when N >= 2 (both v7x TensorCores) while
        # packing the rest of the batch into one block to amortize step overhead.
        batch_block = max(1, N // 2)
    nb = batch_block
    assert N % nb == 0, (N, nb)

    # Channel-major, spatially flattened views (contiguous -> zero transposes).
    low = low_nchw.reshape(N, Cl, Sl).astype(jnp.bfloat16)
    high = high_nchw.reshape(N, Ch, Sh).astype(jnp.bfloat16)

    mw_blk, mh_exp = upsample_operands(Hl, Wl, Hh, Wh)
    inv_sh = 1.0 / Sh

    def kernel(low_ref, high_ref, w_cbr_ref, b_cbr_ref, w_scale_ref,
               w_low_ref, w_high_ref, b_ref, mw_ref, mh_ref, out_ref):
        # Hoisted (per-grid-step) weight loads.
        w_cbr = w_cbr_ref[...]                              # (Ci, Ch) bf16
        b_cbr = b_cbr_ref[...]                              # (Ci, 1)  f32
        w_scale = w_scale_ref[...].astype(jnp.float32)      # (Ci, Ch) f32
        w_low = w_low_ref[...]                              # (K, Cl)  bf16
        w_high = w_high_ref[...]                            # (K, Ci)  bf16
        bias = b_ref[...]                                   # (K, 1)   f32
        mw = mw_ref[...]                                    # (Sh, Sm) bf16
        mh = mh_ref[...]                                    # (Sm, Sl) bf16
        # Lane-dense all-ones MXU operand for the global average pool.
        ones = jnp.ones((Sh, 128), jnp.bfloat16)

        for b in range(nb):                                 # static unroll, nb small
            h = high_ref[b]                                 # (Ch, Sh) bf16
            # cbr branch: BN-folded 1x1 conv + ReLU (f32 elementwise).
            x = jnp.dot(w_cbr, h, preferred_element_type=jnp.float32)
            x = jnp.maximum(x + b_cbr, 0.0)                 # (Ci, Sh) f32
            # scale branch: global average pool on the MXU, 1x1 conv, sigmoid.
            pooled = jnp.dot(h, ones,
                             preferred_element_type=jnp.float32) * inv_sh  # (Ch, 128)
            s = jax.nn.sigmoid(
                jnp.dot(w_scale, pooled,
                        preferred_element_type=jnp.float32)[:, :1])        # (Ci, 1)
            xg = (x * s).astype(jnp.bfloat16)               # gated features (Ci, Sh)
            # 1x1 high classifier BEFORE upsampling (commutes with bilinear
            # resize), so the interpolation runs on K channels instead of Ci.
            z = jnp.dot(w_high, xg,
                        preferred_element_type=jnp.float32)                # (K, Sh)
            # Separable bilinear upsample: two lane-dense matmuls.
            zw = jnp.dot(z.astype(jnp.bfloat16), mw,
                         preferred_element_type=jnp.float32)               # (K, Sm)
            up = jnp.dot(zw.astype(jnp.bfloat16), mh,
                         preferred_element_type=jnp.float32)               # (K, Sl)
            # low classifier + fused (b_low + b_high) bias; ONE dense store.
            out_low = jnp.dot(w_low, low_ref[b],
                              preferred_element_type=jnp.float32) + bias   # (K, Sl)
            out_ref[b] = (out_low + up).astype(out_ref.dtype)

    full2d = lambda shape: pl.BlockSpec(shape, lambda n: (0, 0))

    out_flat = pl.pallas_call(
        kernel,
        out_shape=jax.ShapeDtypeStruct((N, K, Sl), out_dtype),
        grid_spec=pltpu.PrefetchScalarGridSpec(
            num_scalar_prefetch=0,
            grid=(N // nb,),
            in_specs=[
                pl.BlockSpec((nb, Cl, Sl), lambda n: (n, 0, 0)),   # low  (bf16)
                pl.BlockSpec((nb, Ch, Sh), lambda n: (n, 0, 0)),   # high (bf16)
                full2d((Ci, Ch)),      # w_cbr (bf16, BN folded)
                full2d((Ci, 1)),       # b_cbr (f32)
                full2d((Ci, Ch)),      # w_scale (bf16)
                full2d((K, Cl)),       # w_low (bf16)
                full2d((K, Ci)),       # w_high (bf16)
                full2d((K, 1)),        # fused bias (f32)
                full2d((Sh, Sm)),      # width interp operand kron(I_Hh, mw^T)
                full2d((Sm, Sl)),      # height interp operand kron(mh^T, I_Wl)
            ],
            out_specs=pl.BlockSpec((nb, K, Sl), lambda n: (n, 0, 0)),
        ),
        compiler_params=pltpu.CompilerParams(
            dimension_semantics=("parallel",)),
    )(low, high,
      params["w_cbr"], params["b_cbr"], params["w_scale"],
      params["w_low"], params["w_high"], params["b_cls"], mw_blk, mh_exp)

    # (N, K, Sl) is already NCHW-ordered; just unflatten the spatial dims.
    return out_flat.reshape(N, K, Hl, Wl)


def lraspp_head_ref(low_nchw, high_nchw, params):
    """Plain-JAX reference in the module's op order (upsample before the high
    classifier), at matched bf16 input/weight precision."""
    N, Cl, Hl, Wl = low_nchw.shape
    _, Ch, Hh, Wh = high_nchw.shape
    f32 = jnp.float32
    low = low_nchw.astype(jnp.bfloat16).astype(f32)
    high = high_nchw.astype(jnp.bfloat16).astype(f32)
    w_cbr = params["w_cbr"].astype(f32)
    w_scale = params["w_scale"].astype(f32)
    w_low = params["w_low"].astype(f32)
    w_high = params["w_high"].astype(f32)

    x = jnp.maximum(jnp.einsum("oc,nchw->nohw", w_cbr, high)
                    + params["b_cbr"].reshape(1, -1, 1, 1), 0.0)
    pooled = jnp.mean(high, axis=(2, 3))                               # (N, Ch)
    s = jax.nn.sigmoid(jnp.einsum("oc,nc->no", w_scale, pooled))
    x = (x * s[:, :, None, None]).astype(jnp.bfloat16).astype(f32)
    mh = jnp.asarray(bilinear_matrix(Hl, Hh))
    mw = jnp.asarray(bilinear_matrix(Wl, Wh))
    x_up = jnp.einsum("ih,jw,nchw->ncij", mh, mw, x)                   # bilinear resize
    return (jnp.einsum("kc,nchw->nkhw", w_low, low)
            + jnp.einsum("kc,ncij->nkij", w_high, x_up)
            + params["b_cls"].reshape(1, -1, 1, 1))


if __name__ == "__main__":
    # Small shapes consistent with the module:
    #   low_channels=8, high_channels=16, inter_channels=32, num_classes=6,
    #   high is low-resolution (8x8), low is high-resolution (16x16).
    # batch=4 so the default batch_block=2 packs two samples per grid step
    # while keeping 2 parallel grid steps (both v7x TensorCores exercised).
    N, Cl, Ch, Ci, K = 4, 8, 16, 32, 6
    Hh = Wh = 8
    Hl = Wl = 16

    key = jax.random.PRNGKey(0)
    k_low, k_high, k_par = jax.random.split(key, 3)
    low = jax.random.normal(k_low, (N, Cl, Hl, Wl), jnp.float32)
    high = jax.random.normal(k_high, (N, Ch, Hh, Wh), jnp.float32)
    params = make_params(k_par, Cl, Ch, K, Ci)

    out = jax.block_until_ready(lraspp_head(low, high, params))
    ref = jax.block_until_ready(lraspp_head_ref(low, high, params))

    assert out.shape == (N, K, Hl, Wl), out.shape
    assert jnp.allclose(out, ref, atol=1e-2, rtol=1e-2), "mismatch vs reference"

    print("KERNEL_OK")
</pallas_src>

<mosaic_0001>
module attributes {stable_mosaic.version = 11 : i64} {
  func.func @kernel(%arg0: i32, %arg1: memref<2x8x256xbf16, #tpu.memory_space<vmem>>, %arg2: memref<2x16x64xbf16, #tpu.memory_space<vmem>>, %arg3: memref<32x16xbf16, #tpu.memory_space<vmem>>, %arg4: memref<32x1xf32, #tpu.memory_space<vmem>>, %arg5: memref<32x16xbf16, #tpu.memory_space<vmem>>, %arg6: memref<6x8xbf16, #tpu.memory_space<vmem>>, %arg7: memref<6x32xbf16, #tpu.memory_space<vmem>>, %arg8: memref<6x1xf32, #tpu.memory_space<vmem>>, %arg9: memref<64x128xbf16, #tpu.memory_space<vmem>>, %arg10: memref<128x256xbf16, #tpu.memory_space<vmem>>, %arg11: memref<2x6x256xf32, #tpu.memory_space<vmem>>) attributes {dimension_semantics = [#tpu.dimension_semantics<parallel>], iteration_bounds = array<i64: 2>, scalar_prefetch = 0 : i64, scratch_operands = 0 : i64, tpu.core_type = #tpu.core_type<tc>, window_params = [{transform_indices = @transform_0, window_bounds = array<i64: 2, 8, 256>}, {transform_indices = @transform_1, window_bounds = array<i64: 2, 16, 64>}, {pipeline_mode = #tpu.pipeline_mode<synchronous>, transform_indices = @transform_2, window_bounds = array<i64: 32, 16>}, {pipeline_mode = #tpu.pipeline_mode<synchronous>, transform_indices = @transform_3, window_bounds = array<i64: 32, 1>}, {pipeline_mode = #tpu.pipeline_mode<synchronous>, transform_indices = @transform_4, window_bounds = array<i64: 32, 16>}, {pipeline_mode = #tpu.pipeline_mode<synchronous>, transform_indices = @transform_5, window_bounds = array<i64: 6, 8>}, {pipeline_mode = #tpu.pipeline_mode<synchronous>, transform_indices = @transform_6, window_bounds = array<i64: 6, 32>}, {pipeline_mode = #tpu.pipeline_mode<synchronous>, transform_indices = @transform_7, window_bounds = array<i64: 6, 1>}, {pipeline_mode = #tpu.pipeline_mode<synchronous>, transform_indices = @transform_8, window_bounds = array<i64: 64, 128>}, {pipeline_mode = #tpu.pipeline_mode<synchronous>, transform_indices = @transform_9, window_bounds = array<i64: 128, 256>}, {transform_indices = @transform_10, window_bounds = array<i64: 2, 6, 256>}]} {
    %c0 = arith.constant 0 : index
    %c0_0 = arith.constant 0 : index
    %0 = vector.load %arg3[%c0, %c0_0] : memref<32x16xbf16, #tpu.memory_space<vmem>>, vector<32x16xbf16>
    %c0_1 = arith.constant 0 : index
    %c0_2 = arith.constant 0 : index
    %1 = vector.load %arg4[%c0_1, %c0_2] : memref<32x1xf32, #tpu.memory_space<vmem>>, vector<32x1xf32>
    %c0_3 = arith.constant 0 : index
    %c0_4 = arith.constant 0 : index
    %2 = vector.load %arg5[%c0_3, %c0_4] : memref<32x16xbf16, #tpu.memory_space<vmem>>, vector<32x16xbf16>
    %3 = arith.extf %2 : vector<32x16xbf16> to vector<32x16xf32>
    %c0_5 = arith.constant 0 : index
    %c0_6 = arith.constant 0 : index
    %4 = vector.load %arg6[%c0_5, %c0_6] : memref<6x8xbf16, #tpu.memory_space<vmem>>, vector<6x8xbf16>
    %c0_7 = arith.constant 0 : index
    %c0_8 = arith.constant 0 : index
    %5 = vector.load %arg7[%c0_7, %c0_8] : memref<6x32xbf16, #tpu.memory_space<vmem>>, vector<6x32xbf16>
    %c0_9 = arith.constant 0 : index
    %c0_10 = arith.constant 0 : index
    %6 = vector.load %arg8[%c0_9, %c0_10] : memref<6x1xf32, #tpu.memory_space<vmem>>, vector<6x1xf32>
    %c0_11 = arith.constant 0 : index
    %c0_12 = arith.constant 0 : index
    %7 = vector.load %arg9[%c0_11, %c0_12] : memref<64x128xbf16, #tpu.memory_space<vmem>>, vector<64x128xbf16>
    %c0_13 = arith.constant 0 : index
    %c0_14 = arith.constant 0 : index
    %8 = vector.load %arg10[%c0_13, %c0_14] : memref<128x256xbf16, #tpu.memory_space<vmem>>, vector<128x256xbf16>
    %cst = arith.constant 1.000000e+00 : bf16
    %9 = vector.broadcast %cst : bf16 to vector<64x128xbf16>
    %c0_15 = arith.constant 0 : index
    %c0_16 = arith.constant 0 : index
    %c0_17 = arith.constant 0 : index
    %10 = vector.load %arg2[%c0_15, %c0_16, %c0_17] : memref<2x16x64xbf16, #tpu.memory_space<vmem>>, vector<1x16x64xbf16>
    %11 = vector.shape_cast %10 : vector<1x16x64xbf16> to vector<16x64xbf16>
    %cst_18 = arith.constant dense<0.000000e+00> : vector<32x64xf32>
    %12 = tpu.matmul %0, %11, %cst_18 {dimension_numbers = #tpu.dot_dimension_numbers<[1], [0], [0], [1], [0, 0, 1, 1], [], []>} : vector<32x16xbf16>, vector<16x64xbf16>, vector<32x64xf32> -> vector<32x64xf32>
    %13 = vector.broadcast %1 : vector<32x1xf32> to vector<32x64xf32>
    %14 = arith.addf %12, %13 : vector<32x64xf32>
    %cst_19 = arith.constant 0.000000e+00 : f32
    %15 = vector.broadcast %cst_19 : f32 to vector<32x64xf32>
    %16 = arith.maximumf %14, %15 : vector<32x64xf32>
    %cst_20 = arith.constant dense<0.000000e+00> : vector<16x128xf32>
    %17 = tpu.matmul %11, %9, %cst_20 {dimension_numbers = #tpu.dot_dimension_numbers<[1], [0], [0], [1], [0, 0, 1, 1], [], []>} : vector<16x64xbf16>, vector<64x128xbf16>, vector<16x128xf32> -> vector<16x128xf32>
    %cst_21 = arith.constant 1.562500e-02 : f32
    %18 = vector.broadcast %cst_21 : f32 to vector<16x128xf32>
    %19 = arith.mulf %17, %18 : vector<16x128xf32>
    %cst_22 = arith.constant dense<0.000000e+00> : vector<32x128xf32>
    %20 = tpu.matmul %3, %19, %cst_22 {dimension_numbers = #tpu.dot_dimension_numbers<[1], [0], [0], [1], [0, 0, 1, 1], [], []>} : vector<32x16xf32>, vector<16x128xf32>, vector<32x128xf32> -> vector<32x128xf32>
    %21 = vector.extract_strided_slice %20 {offsets = [0, 0], sizes = [32, 1], strides = [1, 1]} : vector<32x128xf32> to vector<32x1xf32>
    %22 = arith.negf %21 : vector<32x1xf32>
    %23 = math.exp %22 : vector<32x1xf32>
    %cst_23 = arith.constant 1.000000e+00 : f32
    %24 = vector.broadcast %cst_23 : f32 to vector<32x1xf32>
    %25 = arith.addf %24, %23 : vector<32x1xf32>
    %26 = arith.divf %24, %25 : vector<32x1xf32>
    %27 = vector.broadcast %26 : vector<32x1xf32> to vector<32x64xf32>
    %28 = arith.mulf %16, %27 : vector<32x64xf32>
    %29 = arith.truncf %28 : vector<32x64xf32> to vector<32x64xbf16>
    %cst_24 = arith.constant dense<0.000000e+00> : vector<6x64xf32>
    %30 = tpu.matmul %5, %29, %cst_24 {dimension_numbers = #tpu.dot_dimension_numbers<[1], [0], [0], [1], [0, 0, 1, 1], [], []>} : vector<6x32xbf16>, vector<32x64xbf16>, vector<6x64xf32> -> vector<6x64xf32>
    %31 = arith.truncf %30 : vector<6x64xf32> to vector<6x64xbf16>
    %cst_25 = arith.constant dense<0.000000e+00> : vector<6x128xf32>
    %32 = tpu.matmul %31, %7, %cst_25 {dimension_numbers = #tpu.dot_dimension_numbers<[1], [0], [0], [1], [0, 0, 1, 1], [], []>} : vector<6x64xbf16>, vector<64x128xbf16>, vector<6x128xf32> -> vector<6x128xf32>
    %33 = arith.truncf %32 : vector<6x128xf32> to vector<6x128xbf16>
    %cst_26 = arith.constant dense<0.000000e+00> : vector<6x256xf32>
    %34 = tpu.matmul %33, %8, %cst_26 {dimension_numbers = #tpu.dot_dimension_numbers<[1], [0], [0], [1], [0, 0, 1, 1], [], []>} : vector<6x128xbf16>, vector<128x256xbf16>, vector<6x256xf32> -> vector<6x256xf32>
    %c0_27 = arith.constant 0 : index
    %c0_28 = arith.constant 0 : index
    %c0_29 = arith.constant 0 : index
    %35 = vector.load %arg1[%c0_27, %c0_28, %c0_29] : memref<2x8x256xbf16, #tpu.memory_space<vmem>>, vector<1x8x256xbf16>
    %36 = vector.shape_cast %35 : vector<1x8x256xbf16> to vector<8x256xbf16>
    %cst_30 = arith.constant dense<0.000000e+00> : vector<6x256xf32>
    %37 = tpu.matmul %4, %36, %cst_30 {dimension_numbers = #tpu.dot_dimension_numbers<[1], [0], [0], [1], [0, 0, 1, 1], [], []>} : vector<6x8xbf16>, vector<8x256xbf16>, vector<6x256xf32> -> vector<6x256xf32>
    %38 = vector.broadcast %6 : vector<6x1xf32> to vector<6x256xf32>
    %39 = arith.addf %37, %38 : vector<6x256xf32>
    %40 = arith.addf %39, %34 : vector<6x256xf32>
    %c0_31 = arith.constant 0 : index
    %c0_32 = arith.constant 0 : index
    %c0_33 = arith.constant 0 : index
    %41 = vector.load %arg11[%c0_31, %c0_32, %c0_33] : memref<2x6x256xf32, #tpu.memory_space<vmem>>, vector<1x6x256xf32>
    %42 = vector.shape_cast %41 : vector<1x6x256xf32> to vector<6x256xf32>
    %43 = vector.shape_cast %40 : vector<6x256xf32> to vector<1x6x256xf32>
    tpu.vector_store %arg11[%c0_31, %c0_32, %c0_33], %43 {strides = array<i32>} : memref<2x6x256xf32, #tpu.memory_space<vmem>>, vector<1x6x256xf32>,
    %c1 = arith.constant 1 : index
    %c0_34 = arith.constant 0 : index
    %c0_35 = arith.constant 0 : index
    %44 = vector.load %arg2[%c1, %c0_34, %c0_35] : memref<2x16x64xbf16, #tpu.memory_space<vmem>>, vector<1x16x64xbf16>
    %45 = vector.shape_cast %44 : vector<1x16x64xbf16> to vector<16x64xbf16>
    %cst_36 = arith.constant dense<0.000000e+00> : vector<32x64xf32>
    %46 = tpu.matmul %0, %45, %cst_36 {dimension_numbers = #tpu.dot_dimension_numbers<[1], [0], [0], [1], [0, 0, 1, 1], [], []>} : vector<32x16xbf16>, vector<16x64xbf16>, vector<32x64xf32> -> vector<32x64xf32>
    %47 = vector.broadcast %1 : vector<32x1xf32> to vector<32x64xf32>
    %48 = arith.addf %46, %47 : vector<32x64xf32>
    %cst_37 = arith.constant 0.000000e+00 : f32
    %49 = vector.broadcast %cst_37 : f32 to vector<32x64xf32>
    %50 = arith.maximumf %48, %49 : vector<32x64xf32>
    %cst_38 = arith.constant dense<0.000000e+00> : vector<16x128xf32>
    %51 = tpu.matmul %45, %9, %cst_38 {dimension_numbers = #tpu.dot_dimension_numbers<[1], [0], [0], [1], [0, 0, 1, 1], [], []>} : vector<16x64xbf16>, vector<64x128xbf16>, vector<16x128xf32> -> vector<16x128xf32>
    %cst_39 = arith.constant 1.562500e-02 : f32
    %52 = vector.broadcast %cst_39 : f32 to vector<16x128xf32>
    %53 = arith.mulf %51, %52 : vector<16x128xf32>
    %cst_40 = arith.constant dense<0.000000e+00> : vector<32x128xf32>
    %54 = tpu.matmul %3, %53, %cst_40 {dimension_numbers = #tpu.dot_dimension_numbers<[1], [0], [0], [1], [0, 0, 1, 1], [], []>} : vector<32x16xf32>, vector<16x128xf32>, vector<32x128xf32> -> vector<32x128xf32>
    %55 = vector.extract_strided_slice %54 {offsets = [0, 0], sizes = [32, 1], strides = [1, 1]} : vector<32x128xf32> to vector<32x1xf32>
    %56 = arith.negf %55 : vector<32x1xf32>
    %57 = math.exp %56 : vector<32x1xf32>
    %cst_41 = arith.constant 1.000000e+00 : f32
    %58 = vector.broadcast %cst_41 : f32 to vector<32x1xf32>
    %59 = arith.addf %58, %57 : vector<32x1xf32>
    %60 = arith.divf %58, %59 : vector<32x1xf32>
    %61 = vector.broadcast %60 : vector<32x1xf32> to vector<32x64xf32>
    %62 = arith.mulf %50, %61 : vector<32x64xf32>
    %63 = arith.truncf %62 : vector<32x64xf32> to vector<32x64xbf16>
    %cst_42 = arith.constant dense<0.000000e+00> : vector<6x64xf32>
    %64 = tpu.matmul %5, %63, %cst_42 {dimension_numbers = #tpu.dot_dimension_numbers<[1], [0], [0], [1], [0, 0, 1, 1], [], []>} : vector<6x32xbf16>, vector<32x64xbf16>, vector<6x64xf32> -> vector<6x64xf32>
    %65 = arith.truncf %64 : vector<6x64xf32> to vector<6x64xbf16>
    %cst_43 = arith.constant dense<0.000000e+00> : vector<6x128xf32>
    %66 = tpu.matmul %65, %7, %cst_43 {dimension_numbers = #tpu.dot_dimension_numbers<[1], [0], [0], [1], [0, 0, 1, 1], [], []>} : vector<6x64xbf16>, vector<64x128xbf16>, vector<6x128xf32> -> vector<6x128xf32>
    %67 = arith.truncf %66 : vector<6x128xf32> to vector<6x128xbf16>
    %cst_44 = arith.constant dense<0.000000e+00> : vector<6x256xf32>
    %68 = tpu.matmul %67, %8, %cst_44 {dimension_numbers = #tpu.dot_dimension_numbers<[1], [0], [0], [1], [0, 0, 1, 1], [], []>} : vector<6x128xbf16>, vector<128x256xbf16>, vector<6x256xf32> -> vector<6x256xf32>
    %c1_45 = arith.constant 1 : index
    %c0_46 = arith.constant 0 : index
    %c0_47 = arith.constant 0 : index
    %69 = vector.load %arg1[%c1_45, %c0_46, %c0_47] : memref<2x8x256xbf16, #tpu.memory_space<vmem>>, vector<1x8x256xbf16>
    %70 = vector.shape_cast %69 : vector<1x8x256xbf16> to vector<8x256xbf16>
    %cst_48 = arith.constant dense<0.000000e+00> : vector<6x256xf32>
    %71 = tpu.matmul %4, %70, %cst_48 {dimension_numbers = #tpu.dot_dimension_numbers<[1], [0], [0], [1], [0, 0, 1, 1], [], []>} : vector<6x8xbf16>, vector<8x256xbf16>, vector<6x256xf32> -> vector<6x256xf32>
    %72 = vector.broadcast %6 : vector<6x1xf32> to vector<6x256xf32>
    %73 = arith.addf %71, %72 : vector<6x256xf32>
    %74 = arith.addf %73, %68 : vector<6x256xf32>
    %c1_49 = arith.constant 1 : index
    %c0_50 = arith.constant 0 : index
    %c0_51 = arith.constant 0 : index
    %75 = vector.load %arg11[%c1_49, %c0_50, %c0_51] : memref<2x6x256xf32, #tpu.memory_space<vmem>>, vector<1x6x256xf32>
    %76 = vector.shape_cast %75 : vector<1x6x256xf32> to vector<6x256xf32>
    %77 = vector.shape_cast %74 : vector<6x256xf32> to vector<1x6x256xf32>
    tpu.vector_store %arg11[%c1_49, %c0_50, %c0_51], %77 {strides = array<i32>} : memref<2x6x256xf32, #tpu.memory_space<vmem>>, vector<1x6x256xf32>,
    return
  }
  func.func @transform_0(%arg0: i32) -> (i32, i32, i32) {
    %c0_i32 = arith.constant 0 : i32
    %c0_i32_0 = arith.constant 0 : i32
    %c0_i32_1 = arith.constant 0 : i32
    return %arg0, %c0_i32, %c0_i32_0 : i32, i32, i32
  }
  func.func @transform_1(%arg0: i32) -> (i32, i32, i32) {
    %c0_i32 = arith.constant 0 : i32
    %c0_i32_0 = arith.constant 0 : i32
    %c0_i32_1 = arith.constant 0 : i32
    return %arg0, %c0_i32, %c0_i32_0 : i32, i32, i32
  }
  func.func @transform_2(%arg0: i32) -> (i32, i32) {
    %c0_i32 = arith.constant 0 : i32
    %c0_i32_0 = arith.constant 0 : i32
    %c0_i32_1 = arith.constant 0 : i32
    return %c0_i32, %c0_i32_0 : i32, i32
  }
  func.func @transform_3(%arg0: i32) -> (i32, i32) {
    %c0_i32 = arith.constant 0 : i32
    %c0_i32_0 = arith.constant 0 : i32
    %c0_i32_1 = arith.constant 0 : i32
    return %c0_i32, %c0_i32_0 : i32, i32
  }
  func.func @transform_4(%arg0: i32) -> (i32, i32) {
    %c0_i32 = arith.constant 0 : i32
    %c0_i32_0 = arith.constant 0 : i32
    %c0_i32_1 = arith.constant 0 : i32
    return %c0_i32, %c0_i32_0 : i32, i32
  }
  func.func @transform_5(%arg0: i32) -> (i32, i32) {
    %c0_i32 = arith.constant 0 : i32
    %c0_i32_0 = arith.constant 0 : i32
    %c0_i32_1 = arith.constant 0 : i32
    return %c0_i32, %c0_i32_0 : i32, i32
  }
  func.func @transform_6(%arg0: i32) -> (i32, i32) {
    %c0_i32 = arith.constant 0 : i32
    %c0_i32_0 = arith.constant 0 : i32
    %c0_i32_1 = arith.constant 0 : i32
    return %c0_i32, %c0_i32_0 : i32, i32
  }
  func.func @transform_7(%arg0: i32) -> (i32, i32) {
    %c0_i32 = arith.constant 0 : i32
    %c0_i32_0 = arith.constant 0 : i32
    %c0_i32_1 = arith.constant 0 : i32
    return %c0_i32, %c0_i32_0 : i32, i32
  }
  func.func @transform_8(%arg0: i32) -> (i32, i32) {
    %c0_i32 = arith.constant 0 : i32
    %c0_i32_0 = arith.constant 0 : i32
    %c0_i32_1 = arith.constant 0 : i32
    return %c0_i32, %c0_i32_0 : i32, i32
  }
  func.func @transform_9(%arg0: i32) -> (i32, i32) {
    %c0_i32 = arith.constant 0 : i32
    %c0_i32_0 = arith.constant 0 : i32
    %c0_i32_1 = arith.constant 0 : i32
    return %c0_i32, %c0_i32_0 : i32, i32
  }
  func.func @transform_10(%arg0: i32) -> (i32, i32, i32) {
    %c0_i32 = arith.constant 0 : i32
    %c0_i32_0 = arith.constant 0 : i32
    %c0_i32_1 = arith.constant 0 : i32
    return %arg0, %c0_i32, %c0_i32_0 : i32, i32, i32
  }
}

</mosaic_0001>

<bundles_post_ra>
// kernel: tpu_custom_call.1
= control target key start
LH: loop header
LB: loop body
LE: loop exit
PB: predicated region body
PF: predicated region fallthrough
CT: control target
= control target key end

     0   :  { %15 = vsyncpa [#allocation3], 0  ;;  %s2006_s13 = smov 0   ;;  %s2353_s0 = inlined_call_operand.vmem [shape: bf16[4,8,256], index: 0, kind: input, shape index: {}]   ;;  %s2354_s1 = inlined_call_operand.vmem [shape: bf16[4,16,64], index: 1, kind: input, shape index: {}]   ;;  %s2355_s2 = inlined_call_operand.vmem [shape: bf16[32,16], index: 2, kind: input, shape index: {}]   ;;  %s2356_s3 = inlined_call_operand.vmem [shape: f32[32,1], index: 3, kind: input, shape index: {}]   ;;  %s2357_s4 = inlined_call_operand.vmem [shape: bf16[32,16], index: 4, kind: input, shape index: {}]   ;;  %s2358_s5 = inlined_call_operand.vmem [shape: bf16[6,8], index: 5, kind: input, shape index: {}]   ;;  %s2359_s6 = inlined_call_operand.vmem [shape: bf16[6,32], index: 6, kind: input, shape index: {}]   ;;  %s2360_s7 = inlined_call_operand.vmem [shape: f32[6,1], index: 7, kind: input, shape index: {}]   ;;  %s2361_s8 = inlined_call_operand.vmem [shape: bf16[64,128], index: 8, kind: input, shape index: {}]   ;;  %s2362_s9 = inlined_call_operand.hbm [shape: bf16[128,256], index: 9, kind: input, shape index: {}]   ;;  %s2363_s10 = inlined_call_operand.vmem [shape: f32[4,6,256], index: 10, kind: output, shape index: {}]  }
   0x1 LB: > { %s1556_s14 = sadd.s32 4294967295, %s1942_s13   ;;  %p1558_p0 = scmp.ge.s32.totalorder %s1942_s13, 1  ;;  %s1942_s13 = sphi %s2006_s13, %s21_s13  }
   0x2   : > { %p272_p1 = scmp.lt.s32.totalorder %s1942_s13, 3  ;;  %s1944_s15 = smov [#allocation2]  }
   0x3   : > { %s305_s16 = sshll.u32 %s1944_s15, 4  ;;  %p2020_p3 = scmp.eq.s32.totalorder %s1556_s14, 0  ;;  %s306_s16 = int_to_ptr.vmem [resolvable:$true] %s305_s16 }
   0x4   : > { %p2014_p2 = pnand %p1558_p0, %p272_p1  ;;  %s1904_s22 = scalar_lea.hbm %s2362_s9, 2048 }
   0x5   : > { %s2368_s18 = scalar_select %p2020_p3, 1, 0 }
   0x6   : > { %s2367_s17 = scalar_select %p2014_p2, 1, 0 }
   0x7   : > { %p1813_p4 = pneg %p2014_p2  ;;  %p1905_p6 = scmp.ne.s32.totalorder %s2362_s9, %s1904_s22 }
   0x8   : > { %p1911_p10 = scmp.lt.u32.totalorder %s1904_s22, %s2362_s9 }
   0x9   : > { %p2028_p5 = pnand %p2020_p3, %p1813_p4 }
   0xb   : > { %p1906_p7 = pneg %p2028_p5 }
   0xd   : > { %p1907_p8 = pnand %p1906_p7, %p1905_p6 }
   0xf   : > { %p1908_p9 = pneg %p1907_p8 }
  0x11   : > { %p1913_p11 = pnand %p1911_p10, %p1908_p9 }
  0x13   : > { %1916 = shalt.err (!%p1913_p11)
}
  0x14   : > { %s1917_s27 = scalar_lea.vmem %s306_s16, 2048  ;;  %p1925_p1 = scmp.lt.s32.totalorder %s306_s16, %s306_s16 }
  0x15   : > { %p1918_p12 = scmp.ne.s32.totalorder %s306_s16, %s1917_s27  ;;  %p1926_p4 = scmp.lt.s32.totalorder %s1917_s27, %s1917_s27 }
  0x17   : > { %p1920_p13 = pnand %p1918_p12, %p1906_p7  ;;  %p1927_p3 = por %p1926_p4, %p1925_p1 }
  0x19   : > { %p1921_p0 = pneg %p1920_p13 }
  0x1b   : > { %p1928_p2 = pnand %p1927_p3, %p1921_p0 }
  0x1d   : > { %1931 = shalt.err (!%p1928_p2)
}
  0x1e   : > { %s1945_s28 = smov 128   ;;  %s1946_s29 = smov 8  }
  0x1f   : > { %1816 = dma.hbm_to_vmem [thread:$0]  (!%p2028_p5), %s2362_s9, 2048, %s306_s16, [#allocation3], %s1945_s28, %s1945_s28, %s1946_s29  }
  0x20   : > { %p2370_p6 = scmp.ne.s32.totalorder %s2367_s17, 0 }
  0x21   : > { %p2371_p8 = scmp.ne.s32.totalorder (!%p2370_p6), %s2368_s18, 0 }
  0x22   : > { %341 = sbr.rel (%p2370_p6) target bundleno = 2163 (0x873), region = 60 }
  0x29   : > { %1937 = dma.done.wait (%p2371_p8), [#allocation3], 2048  }
  0x2a   : > { %1939 = vsyncadd (%p2371_p8), [#allocation3], 4294965248  ;;  %s1563_s12 = sshll.u32 %s1556_s14, 1  ;;  %v1947_v0 = vmov 0   ;;  %vm491_vm0 = vcmask 130048   ;;  %v2072_v2 = vld [vmem:[%s2355_s2] sm:$0xff]  }
  0x2b   : > { %p388_p2 = scmp.lt.s32.totalorder %s1563_s12, 3  ;;  %1835 = vset.pattern.permute.xlu1 %v1947_v0  ;;  %1834 = vset.pattern.permute.xlu0 %v1947_v0  ;;  %v2077_v3 = vld [vmem:[%s2355_s2 + $0x8] sm:$0xff]   ;;  %v416_v4 = vld [vmem:[%s2356_s3 + $0x10] sm:$0xff]  ;;  %v414_v5 = vld [vmem:[%s2356_s3] sm:$0xff]  ;;  %v1948_v7 = vmov 0.0   ;;  %vm1950_vm1 = vmmov 0  }
  0x2c   : > { %1695 = vmatprep.mubr.msk.bf16.mxu1 %vm491_vm0, %v2072_v2  ;;  %v417_v6 = vld [vmem:[%s2356_s3 + $0x18] sm:$0xff]  ;;  %467 = vperm.xlu1 %1835, %v416_v4   ;;  %v415_v8 = vld [vmem:[%s2356_s3 + $0x8] sm:$0xff]  ;;  %v1949_v9 = vmov 1065369472   ;;  %vm551_vm2 = vcmask 523264   ;;  %v2112_v10 = vld [vmem:[%s2357_s4] sm:$0xff]  }
  0x2d   : > { %s2373_s12 = smov (!%p388_p2, %s1563_s12), 3  ;;  %457 = vperm.xlu0 %1834, %v414_v5   ;;  %v1642_v11 = vunpack.c.l.bf16 %v2112_v10  ;;  %v2121_v23 = vld [vmem:[%s2357_s4 + $0x8] sm:$0xff]   ;;  %v1643_v24 = vunpack.c.h.bf16 %v2112_v10  ;;  %vm745_vm3 = vcmask 261120   ;;  %vm994_vm4 = vcmask 1043456  }
  0x2e   : > { %s1637_s15 = sshll.u32 %s2373_s12, 3  ;;  %v1646_v25 = vunpack.c.l.bf16 %v2121_v23  ;;  %v1647_v26 = vunpack.c.h.bf16 %v2121_v23  ;;  %vm990_vm5 = vcmask 64512   ;;  %s1639_s17 = sshll.u32 %s2373_s12, 4 }
  0x2f   : > { %s2066_s18 = scalar_lea.vmem %s2354_s1, %s1637_s15  ;;  %1715 = vmatprep.mubr.msk.f32.mxu0 %vm491_vm0, %v1642_v11  ;;  %s2259_s29 = scalar_lea.vmem %s2353_s0, %s1637_s15 }
  0x30   : > { %v1836_v1 = vld [vmem:[%s2066_s18] sm:$0xff]   ;;  %472 = vperm.xlu1 %1835, %v417_v6   ;;  %s2318_s20 = scalar_lea.vmem %s2363_s10, %s1639_s17 }
  0x31   : > { %1693 = vmatprep.subr.bf16.mxu1 %v1836_v1  ;;  %462 = vperm.xlu0 %1834, %v415_v8  }
  0x32   : > { %1694 = vmatpush3.bf16.msra.mxu1 %v1836_v1 }
  0x33   : > { %1699 = vmatprep.subr.bf16.mxu1 %v1948_v7 }
  0x35   : > { %1696 = vmatmul.mubr.msk.bf16.vlgmr.msra.gmra.mrb[0].mxu1 %vm491_vm0, %v2077_v3 }
  0x36   : > { %1700 = vmatpush3.bf16.msra.mxu1 %v1949_v9  ;;  %1707 = vmatprep.mubr.msk.bf16.mxu1 %vm1950_vm1, %v1948_v7 }
  0x37   : > { %1701 = vmatprep.subr.bf16.mxu1 %v1948_v7 }
  0x3a   : > { %1702 = vmatpush3.bf16.msra.mxu1 %v1949_v9 }
  0x3b   : > { %1703 = vmatprep.subr.bf16.mxu1 %v1948_v7 }
  0x3e   : > { %1704 = vmatpush3.bf16.msra.mxu1 %v1949_v9 }
  0x3f   : > { %1705 = vmatprep.subr.bf16.mxu1 %v1948_v7 }
  0x42   : > { %1706 = vmatpush3.bf16.msra.mxu1 %v1949_v9 }
  0x43   : > { %1721 = vmatprep.subr.bf16.mxu1 %v1948_v7 }
  0x45   : > { %1708 = vmatmul.mubr.msk.bf16.vlgmr.msra.gmra.mrb[4].mxu1 %vm551_vm2, %v1836_v1 }
  0x46   : > { %1725 = vmatprep.mubr.msk.bf16.mxu1 %vm1950_vm1, %v1948_v7 }
  0xab   : > { %v2138_v48 = vpop.permute.xlu1 %467 }
  0xac   : > { %v2136_v47 = vpop.permute.xlu0 %457 }
  0xaf   : > { %v2144_v52 = vpop.permute.xlu1 %472 }
  0xb0   : > { %v2140_v49 = vpop.permute.xlu0 %462 }
 0x108   : > { %v1697_v12 = vpop.f32.mrb[0].mxu1 }
 0x109   : > { %v532_v13 = vpop.f32.mrb[1].mxu1  ;;  %v541_v55 = vadd.f32 %v1697_v12, %v2138_v48  ;;  %v2152_v12 = vld [vmem:[%s2359_s6] sm:$0x7] }
 0x10a   : > { %v1698_v14 = vpop.f32.mrb[2].mxu1  ;;  %v533_v51 = vadd.f32 %v532_v13, %v2136_v47  ;;  %v2157_v13 = vld [vmem:[%s2361_s8] sm:$0xff]  }
 0x10b   : > { %v535_v15 = vpop.f32.mrb[3].mxu1  ;;  %v544_v53 = vadd.f32 %v1698_v14, %v2144_v52  ;;  %v549_v62 = vmax.f32 %v541_v55, 0.0  ;;  %v2166_v14 = vld [vmem:[%s2361_s8 + $0x8] sm:$0xff]  }
 0x10c   : > { %v536_v50 = vadd.f32 %v535_v15, %v2140_v49  ;;  %v547_v56 = vmax.f32 %v533_v51, 0.0  ;;  %v2175_v15 = vld [vmem:[%s2361_s8 + $0x10] sm:$0xff]  }
 0x10d   : > { %v550_v61 = vmax.f32 %v544_v53, 0.0 }
 0x10e   : > { %v548_v54 = vmax.f32 %v536_v50, 0.0 }
 0x118   : > { %v589_v16 = vpop.f32.mrb[4].mxu1 }
 0x119   : > { %v1709_v17 = vpop.f32.mrb[5].mxu1  ;;  %v596_v19 = vmul.f32 0.015625, %v589_v16  ;;  %v2183_v16 = vld [vmem:[%s2361_s8 + $0x18] sm:$0xff]  }
 0x11a   : > { %v592_v18 = vpop.f32.mrb[6].mxu1  ;;  %v1843_v17 = vld [vmem:[%s2066_s18 + $0x8] sm:$0xff]  }
 0x11b   : > { %v597_v20 = vmul.f32 0.015625, %v592_v18  ;;  %v1710_v21 = vpop.f32.mrb[7].mxu1  ;;  %v2187_v18 = vld [vmem:[#allocation2] ss:$8 sps:$4 sm:$0xff]  }
 0x11c   : > { %v2195_v21 = vld [vmem:[#allocation2 + $0x10] ss:$8 sps:$4 sm:$0xff]  }
 0x11d   : > { %v1789_v22 = vpack.c.bf16 %v597_v20, %v596_v19  ;;  %v2189_v19 = vld [vmem:[#allocation2 + $0x4] ss:$8 sps:$4 sm:$0xff]   ;;  %v2191_v20 = vld [vmem:[#allocation2 + $0x14] ss:$8 sps:$4 sm:$0xff]  }
 0x11f   : > { %1790 = vmatprep.subr.bf16.mxu0 %v1789_v22 }
 0x120   : > { %1792 = vmatpush3.bf16.msra.mxu0 %v1789_v22  ;;  %v2198_v22 = vld [vmem:[#allocation2 + $0x24] ss:$8 sps:$4 sm:$0xff]  }
 0x121   : > { %938 = vmatprep.subr.bf16.mxu0 %v2189_v19 }
 0x123   : > { %1716 = vmatmul.mubr.msk.f32.vlgmr.msra.gmra.mrb[0].mxu0 %vm491_vm0, %v1643_v24 }
 0x124   : > { %1718 = vmatprep.mubr.msk.f32.mxu0 %vm491_vm0, %v1646_v25  ;;  %939 = vmatpush1.bf16.msra.mxu0 %v2187_v18 }
 0x125   : > { %940 = vmatprep.subr.bf16.mxu0 %v2191_v20 }
 0x127   : > { %1719 = vmatmul.mubr.msk.f32.gmra.mrb[2].mxu0 %vm491_vm0, %v1647_v26 }
 0x128   : > { %970 = vmatprep.mubr.bf16.mxu0 %v1947_v0  ;;  %941 = vmatpush1.bf16.msra.mxu0 %v2195_v21 }
 0x129   : > { %942 = vmatprep.subr.bf16.mxu0 %v2198_v22 }
 0x1f6   : > { %v1717_v27 = vpop.f32.mrb[0].mxu0 }
 0x1f7   : > { %v1583_v28 = vmul.f32 -1.442695, %v1717_v27  ;;  %v676_v29 = vpop.f32.mrb[1].mxu0  ;;  %v2201_v27 = vld [vmem:[#allocation2 + $0x20] ss:$8 sps:$4 sm:$0xff]  }
 0x1f8   : > { %v1582_v30 = vmul.f32 -1.442695, %v676_v29  ;;  %943 = vmatpush1.bf16.msra.mxu0 %v2201_v27  ;;  %v2207_v29 = vld [vmem:[#allocation2 + $0x30] ss:$8 sps:$4 sm:$0xff]  }
 0x1f9   : > { %1872 = vpow2.f32 %v1583_v28  ;;  %v2204_v28 = vld [vmem:[#allocation2 + $0x34] ss:$8 sps:$4 sm:$0xff]  }
 0x1fa   : > { %1874 = vpow2.f32 %v1582_v30  ;;  %v1720_v31 = vpop.f32.mrb[2].mxu0  ;;  %944 = vmatprep.subr.bf16.mxu0 %v2204_v28  ;;  %v2210_v30 = vld [vmem:[#allocation2 + $0x44] ss:$8 sps:$4 sm:$0xff]  }
 0x1fb   : > { %v1585_v32 = vmul.f32 -1.442695, %v1720_v31  ;;  %v686_v33 = vpop.f32.mrb[3].mxu0  ;;  %v2213_v31 = vld [vmem:[#allocation2 + $0x40] ss:$8 sps:$4 sm:$0xff]  }
 0x1fc   : > { %v1584_v34 = vmul.f32 -1.442695, %v686_v33  ;;  %945 = vmatpush1.bf16.msra.mxu0 %v2207_v29  ;;  %v2219_v33 = vld [vmem:[#allocation2 + $0x50] ss:$8 sps:$4 sm:$0xff]  }
 0x1fd   : > { %1876 = vpow2.f32 %v1585_v32  ;;  %946 = vmatprep.subr.bf16.mxu0 %v2210_v30  ;;  %v2216_v32 = vld [vmem:[#allocation2 + $0x54] ss:$8 sps:$4 sm:$0xff]  }
 0x1fe   : > { %1878 = vpow2.f32 %v1584_v34  ;;  %v2222_v34 = vld [vmem:[#allocation2 + $0x64] ss:$8 sps:$4 sm:$0xff]  }
 0x200   : > { %947 = vmatpush1.bf16.msra.mxu0 %v2213_v31 }
 0x201   : > { %948 = vmatprep.subr.bf16.mxu0 %v2216_v32 }
 0x203   : > { %v1873_v35 = vpop.eup %1872 }
 0x204   : > { %v1875_v36 = vpop.eup %1874  ;;  %v708_v37 = vadd.f32 1.0, %v1873_v35  ;;  %949 = vmatpush1.bf16.msra.mxu0 %v2219_v33  ;;  %v2225_v35 = vld [vmem:[#allocation2 + $0x60] ss:$8 sps:$4 sm:$0xff]  }
 0x205   : > { %v707_v38 = vadd.f32 1.0, %v1875_v36  ;;  %950 = vmatprep.subr.bf16.mxu0 %v2222_v34  ;;  %v2228_v36 = vld [vmem:[#allocation2 + $0x74] ss:$8 sps:$4 sm:$0xff]  }
 0x206   : > { %1880 = vrcp.f32 %v708_v37  ;;  %v2231_v37 = vld [vmem:[#allocation2 + $0x70] ss:$8 sps:$4 sm:$0xff]  }
 0x207   : > { %v1877_v39 = vpop.eup %1876  ;;  %1882 = vrcp.f32 %v707_v38 }
 0x208   : > { %v1879_v40 = vpop.eup %1878  ;;  %v710_v41 = vadd.f32 1.0, %v1877_v39  ;;  %951 = vmatpush1.bf16.msra.mxu0 %v2225_v35 }
 0x209   : > { %v709_v42 = vadd.f32 1.0, %v1879_v40  ;;  %952 = vmatprep.subr.bf16.mxu0 %v2228_v36 }
 0x20a   : > { %1884 = vrcp.f32 %v710_v41 }
 0x20b   : > { %1886 = vrcp.f32 %v709_v42 }
 0x20c   : > { %953 = vmatpush1.bf16.msra.mxu0 %v2231_v37 }
 0x210   : > { %v1881_v43 = vpop.eup %1880 }
 0x211   : > { %v1883_v44 = vpop.eup %1882  ;;  %726 = vperm.xlu1 %1835, %v1881_v43  }
 0x212   : > { %721 = vperm.xlu0 %1834, %v1883_v44  }
 0x214   : > { %v1885_v45 = vpop.eup %1884 }
 0x215   : > { %v1887_v46 = vpop.eup %1886  ;;  %736 = vperm.xlu1 %1835, %v1885_v45  }
 0x216   : > { %731 = vperm.xlu0 %1834, %v1887_v46  }
 0x290   : > { %v727_v57 = vpop.permute.xlu1 %726 }
 0x291   : > { %v740_v58 = vmul.f32 %v727_v57, %v548_v54  ;;  %v722_v59 = vpop.permute.xlu0 %721 }
 0x292   : > { %v739_v60 = vmul.f32 %v722_v59, %v547_v56  ;;  %v2277_v56 = vld [vmem:[%s2358_s5] sm:$0x7] }
 0x294   : > { %v743_v63 = vpack.c.bf16 %v740_v58, %v739_v60  ;;  %v737_v1 = vpop.permute.xlu1 %736 }
 0x295   : > { %v742_v4 = vmul.f32 %v737_v1, %v550_v61  ;;  %v732_v5 = vpop.permute.xlu0 %731 }
 0x296   : > { %v741_v6 = vmul.f32 %v732_v5, %v549_v62  ;;  %1722 = vmatpush3.bf16.msra.mxu1 %v743_v63 }
 0x297   : > { %1723 = vmatprep.subr.bf16.mxu1 %v1948_v7 }
 0x298   : > { %v744_v8 = vpack.c.bf16 %v742_v4, %v741_v6 }
 0x29a   : > { %1724 = vmatpush3.bf16.msra.mxu1 %v744_v8 }
 0x29b   : > { %1729 = vmatprep.subr.bf16.mxu1 %v1948_v7 }
 0x29d   : > { %1726 = vmatmul.mubr.msk.bf16.vlgmr.msra.gmra.mrb[8].mxu1 %vm745_vm3, %v2152_v12 }
 0x29e   : > { %1730 = vmatpush3.bf16.msra.mxu1 %v2157_v13  ;;  %1737 = vmatprep.mubr.msk.bf16.mxu1 %vm1950_vm1, %v1948_v7 }
 0x29f   : > { %1731 = vmatprep.subr.bf16.mxu1 %v1948_v7 }
 0x2a2   : > { %1732 = vmatpush3.bf16.msra.mxu1 %v2166_v14 }
 0x2a3   : > { %1733 = vmatprep.subr.bf16.mxu1 %v1948_v7 }
 0x2a6   : > { %1734 = vmatpush3.bf16.msra.mxu1 %v2175_v15 }
 0x2a7   : > { %1735 = vmatprep.subr.bf16.mxu1 %v1948_v7 }
 0x2aa   : > { %1736 = vmatpush3.bf16.msra.mxu1 %v2183_v16 }
 0x2ab   : > { %1741 = vmatprep.subr.bf16.mxu1 %v1843_v17 }
 0x370   : > { %v783_v38 = vpop.f32.mrb[8].mxu1 }
 0x371   : > { %v789_v39 = vpack.c.bf16 %v783_v38, %v783_v38  ;;  %v1727_v40 = vpop.f32.mrb[9].mxu1 }
 0x372   : > { %v786_v41 = vpop.f32.mrb[10].mxu1 }
 0x373   : > { %v1728_v42 = vpop.f32.mrb[11].mxu1  ;;  %1738 = vmatmul.mubr.msk.bf16.vlgmr.msra.gmra.mrb[12].mxu1 %vm551_vm2, %v789_v39 }
 0x374   : > { %1742 = vmatpush3.bf16.msra.mxu1 %v1843_v17  ;;  %1743 = vmatprep.mubr.msk.bf16.mxu1 %vm491_vm0, %v2072_v2  ;;  %v979_v2 = vld [vmem:[%s2259_s29] sm:$0xff] }
 0x375   : > { %1747 = vmatprep.subr.bf16.mxu1 %v1948_v7  ;;  %v1608_v43 = vcombine.low %v979_v2, %v979_v2 }
 0x377   : > { %v996_v46 = vsel %vm994_vm4, %v1608_v43, 0 }
 0x37b   : > { %1744 = vmatmul.mubr.msk.bf16.vlgmr.msra.gmra.mrb[16].mxu1 %vm491_vm0, %v2077_v3  ;;  %v1609_v3 = vcombine.high %v979_v2, %v979_v2 }
 0x37c   : > { %1748 = vmatpush3.bf16.msra.mxu1 %v1949_v9  ;;  %1755 = vmatprep.mubr.msk.bf16.mxu1 %vm1950_vm1, %v1948_v7 }
 0x37d   : > { %1749 = vmatprep.subr.bf16.mxu1 %v1948_v7  ;;  %1610 = vmatprep.subr.msk.bf16.mxu0 %vm994_vm4, %v1609_v3 }
 0x380   : > { %1750 = vmatpush3.bf16.msra.mxu1 %v1949_v9 }
 0x381   : > { %1751 = vmatprep.subr.bf16.mxu1 %v1948_v7 }
 0x384   : > { %1752 = vmatpush3.bf16.msra.mxu1 %v1949_v9 }
 0x385   : > { %1753 = vmatprep.subr.bf16.mxu1 %v1948_v7 }
 0x388   : > { %1754 = vmatpush3.bf16.msra.mxu1 %v1949_v9 }
 0x38b   : > { %1756 = vmatmul.mubr.msk.bf16.vlgmr.msra.gmra.mrb[20].mxu1 %vm551_vm2, %v1843_v17 }
 0x38c   : > { %1763 = vmatprep.mubr.msk.f32.mxu1 %vm491_vm0, %v1642_v11 }
 0x446   : > { %v851_v9 = vpop.f32.mrb[12].mxu1 }
 0x447   : > { %v857_v44 = vpack.c.bf16 %v851_v9, %v851_v9  ;;  %v1739_v45 = vpop.f32.mrb[13].mxu1 }
 0x448   : > { %v854_v50 = vpop.f32.mrb[14].mxu1 }
 0x449   : > { %v1740_v11 = vpop.f32.mrb[15].mxu1  ;;  %971 = vmatmul.mubr.bf16.vlgmr.msra.gmra.mrb[4].mxu0 %v857_v44  ;;  %v428_v44 = vld [vmem:[%s2360_s7] sm:$0x3f] }
 0x44a   : > { %1002 = vmatpush1.bf16.msra.mxu0 %v996_v46  ;;  %1033 = vmatprep.mubr.bf16.mxu0 %v1947_v0 }
 0x44b   : > { %1769 = vmatprep.subr.bf16.mxu0 %v1948_v7 }
 0x44e   : > { %v2266_v51 = vpop.f32.mrb[16].mxu1 }
 0x44f   : > { %v2268_v53 = vpop.f32.mrb[17].mxu1 }
 0x450   : > { %v2270_v54 = vpop.f32.mrb[18].mxu1  ;;  %v1090_v46 = vadd.f32 %v2268_v53, %v2136_v47 }
 0x451   : > { %v2272_v55 = vpop.f32.mrb[19].mxu1  ;;  %v1101_v50 = vadd.f32 %v2270_v54, %v2144_v52 }
 0x452   : > { %v1093_v45 = vadd.f32 %v2272_v55, %v2140_v49 }
 0x454   : > { %v1105_v11 = vmax.f32 %v1093_v45, 0.0 }
 0x455   : > { %1611 = vmatmul.mubr.msk.bf16.vlgmr.msra.gmra.mrb[4].mxu0 %vm990_vm5, %v2277_v56 }
 0x456   : > { %1773 = vmatprep.mubr.msk.bf16.mxu0 %vm1950_vm1, %v1948_v7 }
 0x45e   : > { %v1145_v57 = vpop.f32.mrb[20].mxu1 }
 0x45f   : > { %v1757_v58 = vpop.f32.mrb[21].mxu1  ;;  %v1152_v60 = vmul.f32 0.015625, %v1145_v57  ;;  %v1098_v57 = vadd.f32 %v2266_v51, %v2138_v48 }
 0x460   : > { %v1148_v59 = vpop.f32.mrb[22].mxu1  ;;  %v1104_v58 = vmax.f32 %v1090_v46, 0.0 }
 0x461   : > { %v1153_v61 = vmul.f32 0.015625, %v1148_v59  ;;  %v1758_v62 = vpop.f32.mrb[23].mxu1 }
 0x463   : > { %v1793_v63 = vpack.c.bf16 %v1153_v61, %v1152_v60 }
 0x465   : > { %1794 = vmatprep.subr.bf16.mxu1 %v1793_v63 }
 0x466   : > { %1796 = vmatpush3.bf16.msra.mxu1 %v1793_v63  ;;  %v1107_v63 = vmax.f32 %v1101_v50, 0.0 }
 0x467   : > { %1777 = vmatprep.subr.bf16.mxu1 %v1948_v7 }
 0x469   : > { %1764 = vmatmul.mubr.msk.f32.vlgmr.msra.gmra.mrb[24].mxu1 %vm491_vm0, %v1643_v24 }
 0x46a   : > { %1766 = vmatprep.mubr.msk.f32.mxu1 %vm491_vm0, %v1646_v25  ;;  %1778 = vmatpush3.bf16.msra.mxu1 %v2157_v13 }
 0x46b   : > { %1779 = vmatprep.subr.bf16.mxu1 %v1948_v7 }
 0x46d   : > { %1767 = vmatmul.mubr.msk.f32.gmra.mrb[26].mxu1 %vm491_vm0, %v1647_v26 }
 0x46e   : > { %1780 = vmatpush3.bf16.msra.mxu1 %v2166_v14  ;;  %1785 = vmatprep.mubr.msk.bf16.mxu1 %vm1950_vm1, %v1948_v7 }
 0x46f   : > { %1781 = vmatprep.subr.bf16.mxu1 %v1948_v7 }
 0x472   : > { %1782 = vmatpush3.bf16.msra.mxu1 %v2175_v15 }
 0x473   : > { %1783 = vmatprep.subr.bf16.mxu1 %v1948_v7 }
 0x476   : > { %1784 = vmatpush3.bf16.msra.mxu1 %v2183_v16 }
 0x528   : > { %v1035_v10 = vpop.f32.mrb[4].mxu0 }
 0x529   : > { %v1037_v24 = vpop.f32.mrb[5].mxu0 }
 0x52a   : > { %v1039_v25 = vpop.f32.mrb[6].mxu0 }
 0x52b   : > { %v1040_v1 = vpop.f32.mrb[7].mxu0  ;;  %v1106_v25 = vmax.f32 %v1098_v57, 0.0 }
 0x53c   : > { %v1765_v23 = vpop.f32.mrb[24].mxu1 }
 0x53d   : > { %v1623_v4 = vmul.f32 -1.442695, %v1765_v23  ;;  %v1220_v26 = vpop.f32.mrb[25].mxu1 }
 0x53e   : > { %v1622_v5 = vmul.f32 -1.442695, %v1220_v26 }
 0x53f   : > { %1888 = vpow2.f32 %v1623_v4 }
 0x540   : > { %1890 = vpow2.f32 %v1622_v5  ;;  %v1768_v6 = vpop.f32.mrb[26].mxu1 }
 0x541   : > { %v1625_v8 = vmul.f32 -1.442695, %v1768_v6  ;;  %v1230_v13 = vpop.f32.mrb[27].mxu1 }
 0x542   : > { %v1624_v14 = vmul.f32 -1.442695, %v1230_v13 }
 0x543   : > { %1892 = vpow2.f32 %v1625_v8 }
 0x544   : > { %1894 = vpow2.f32 %v1624_v14 }
 0x549   : > { %v1889_v15 = vpop.eup %1888 }
 0x54a   : > { %v1891_v17 = vpop.eup %1890  ;;  %v1252_v38 = vadd.f32 1.0, %v1889_v15 }
 0x54b   : > { %v1251_v16 = vadd.f32 1.0, %v1891_v17 }
 0x54c   : > { %1896 = vrcp.f32 %v1252_v38 }
 0x54d   : > { %v1893_v39 = vpop.eup %1892  ;;  %1898 = vrcp.f32 %v1251_v16 }
 0x54e   : > { %v1895_v40 = vpop.eup %1894  ;;  %v1254_v41 = vadd.f32 1.0, %v1893_v39 }
 0x54f   : > { %v1253_v42 = vadd.f32 1.0, %v1895_v40 }
 0x550   : > { %1900 = vrcp.f32 %v1254_v41 }
 0x551   : > { %1902 = vrcp.f32 %v1253_v42 }
 0x556   : > { %v1897_v2 = vpop.eup %1896 }
 0x557   : > { %v1899_v3 = vpop.eup %1898  ;;  %1270 = vperm.xlu1 %1835, %v1897_v2  }
 0x558   : > { %1265 = vperm.xlu0 %1834, %v1899_v3  }
 0x55a   : > { %v1901_v43 = vpop.eup %1900 }
 0x55b   : > { %v1903_v9 = vpop.eup %1902  ;;  %1280 = vperm.xlu1 %1835, %v1901_v43  }
 0x55c   : > { %1275 = vperm.xlu0 %1834, %v1903_v9  }
 0x560   : > { %982 = vperm.xlu0 %1834, %v428_v44  }
 0x5d6   : > { %v1271_v59 = vpop.permute.xlu1 %1270 }
 0x5d7   : > { %v1284_v60 = vmul.f32 %v1271_v59, %v1105_v11  ;;  %v1266_v61 = vpop.permute.xlu0 %1265 }
 0x5d8   : > { %v1283_v62 = vmul.f32 %v1266_v61, %v1104_v58 }
 0x5da   : > { %v1287_v1 = vpack.c.bf16 %v1284_v60, %v1283_v62  ;;  %v1281_v49 = vpop.permute.xlu1 %1280 }
 0x5db   : > { %v1286_v55 = vmul.f32 %v1281_v49, %v1107_v63  ;;  %v1276_v23 = vpop.permute.xlu0 %1275 }
 0x5dc   : > { %v1285_v47 = vmul.f32 %v1276_v23, %v1106_v25  ;;  %1770 = vmatpush3.bf16.msra.mxu0 %v1287_v1 }
 0x5dd   : > { %1771 = vmatprep.subr.bf16.mxu0 %v1948_v7 }
 0x5de   : > { %v1288_v52 = vpack.c.bf16 %v1286_v55, %v1285_v47 }
 0x5df   : > { %v983_v48 = vpop.permute.xlu0 %982 }
 0x5e0   : > { %v1036_v51 = vadd.f32 %v1035_v10, %v983_v48  ;;  %v1038_v53 = vadd.f32 %v1037_v24, %v983_v48  ;;  %1772 = vmatpush3.bf16.msra.mxu0 %v1288_v52 }
 0x5e1   : > { %1374 = vmatprep.subr.bf16.mxu0 %v2189_v19 }
 0x5e2   : > { %1044 = vst [vmem:[%s2318_s20] sm:$0x3f] %v1036_v51  ;;  %1045 = vst [vmem:[%s2318_s20 + $0x8] sm:$0x3f] %v1038_v53 }
 0x5e3   : > { %1774 = vmatmul.mubr.msk.bf16.vlgmr.msra.gmra.mrb[8].mxu0 %vm745_vm3, %v2152_v12 }
 0x5e4   : > { %1375 = vmatpush1.bf16.msra.mxu0 %v2187_v18  ;;  %1406 = vmatprep.mubr.bf16.mxu0 %v1947_v0 }
 0x5e5   : > { %1376 = vmatprep.subr.bf16.mxu0 %v2191_v20 }
 0x5e8   : > { %1377 = vmatpush1.bf16.msra.mxu0 %v2195_v21  ;;  %v1628_v21 = vld [vmem:[%s2259_s29 + $0x8] sm:$0xff] }
 0x5e9   : > { %1378 = vmatprep.subr.bf16.mxu0 %v2198_v22  ;;  %v1630_v22 = vcombine.high %v1628_v21, %v1628_v21 }
 0x5ec   : > { %1379 = vmatpush1.bf16.msra.mxu0 %v2201_v27  ;;  %v1629_v27 = vcombine.low %v1628_v21, %v1628_v21 }
 0x5ed   : > { %1380 = vmatprep.subr.bf16.mxu0 %v2204_v28 }
 0x5f0   : > { %1381 = vmatpush1.bf16.msra.mxu0 %v2207_v29 }
 0x5f1   : > { %1382 = vmatprep.subr.bf16.mxu0 %v2210_v30 }
 0x5f4   : > { %1383 = vmatpush1.bf16.msra.mxu0 %v2213_v31  ;;  %v1423_v31 = vsel %vm994_vm4, %v1629_v27, 0 }
 0x5f5   : > { %1384 = vmatprep.subr.bf16.mxu0 %v2216_v32 }
 0x5f8   : > { %1385 = vmatpush1.bf16.msra.mxu0 %v2219_v33 }
 0x5f9   : > { %1386 = vmatprep.subr.bf16.mxu0 %v2222_v34 }
 0x5fc   : > { %1387 = vmatpush1.bf16.msra.mxu0 %v2225_v35 }
 0x5fd   : > { %1388 = vmatprep.subr.bf16.mxu0 %v2228_v36 }
 0x600   : > { %1389 = vmatpush1.bf16.msra.mxu0 %v2231_v37 }
 0x601   : > { %1631 = vmatprep.subr.msk.bf16.mxu0 %vm994_vm4, %v1630_v22 }
 0x6b6   : > { %v1323_v7 = vpop.f32.mrb[8].mxu0 }
 0x6b7   : > { %v1329_v12 = vpack.c.bf16 %v1323_v7, %v1323_v7  ;;  %v1775_v18 = vpop.f32.mrb[9].mxu0 }
 0x6b8   : > { %v1326_v19 = vpop.f32.mrb[10].mxu0 }
 0x6b9   : > { %1786 = vmatmul.mubr.msk.bf16.vlgmr.msra.gmra.mrb[28].mxu1 %vm551_vm2, %v1329_v12  ;;  %v1776_v20 = vpop.f32.mrb[11].mxu0 }
 0x78c   : > { %v1367_v28 = vpop.f32.mrb[28].mxu1 }
 0x78d   : > { %v1373_v29 = vpack.c.bf16 %v1367_v28, %v1367_v28  ;;  %v1787_v30 = vpop.f32.mrb[29].mxu1 }
 0x78e   : > { %v1370_v32 = vpop.f32.mrb[30].mxu1 }
 0x78f   : > { %1407 = vmatmul.mubr.bf16.vlgmr.msra.gmra.mrb[12].mxu0 %v1373_v29  ;;  %v1788_v33 = vpop.f32.mrb[31].mxu1 }
 0x790   : > { %1429 = vmatpush1.bf16.msra.mxu0 %v1423_v31  ;;  %1460 = vmatprep.mubr.bf16.mxu0 %v1947_v0 }
 0x79b   : > { %1632 = vmatmul.mubr.msk.bf16.vlgmr.msra.gmra.mrb[12].mxu0 %vm990_vm5, %v2277_v56 }
 0x86e   : > { %v1462_v34 = vpop.f32.mrb[12].mxu0 }
 0x86f   : > { %v1463_v35 = vadd.f32 %v1462_v34, %v983_v48  ;;  %v1464_v36 = vpop.f32.mrb[13].mxu0 }
 0x870   : > { %v1465_v37 = vadd.f32 %v1464_v36, %v983_v48  ;;  %v1466_v54 = vpop.f32.mrb[14].mxu0 }
 0x871   : > { %1633 = vst [vmem:[%s2318_s20 + $0x10] sm:$0x3f] %v1463_v35  ;;  %v1467_v10 = vpop.f32.mrb[15].mxu0 }
 0x872   : > { %1634 = vst [vmem:[%s2318_s20 + $0x18] sm:$0x3f] %v1465_v37 }
 0x873 PF: > { %s21_s13 = sadd.s32 1, %s1942_s13  }
 0x874   : > { %p18_p3 = scmp.ge.s32.totalorder %s21_s13, 4  }
 0x876   :  { %20 = sbr.rel (!%p18_p3) target bundleno = 1 (0x1), region = 101 }
 0x87d   :  { %1498 = vsyncpa [#allocation3], 1 }
 0x87e   :  { %1500 = vsyncpa [#allocation3 + $0x1], 1 }

</bundles_post_ra>
